<compile_context>
chip_gen: v6e
topology: v6e:2x2x1
jax: 0.10.0
libtpu: 0.0.40
codegen_flags: <defaults>
</compile_context>

<pallas_src>
import functools

import jax
import jax.numpy as jnp
from jax.experimental import pallas as pl
from jax.experimental.pallas import tpu as pltpu


def _pos_emb_kernel(x_ref, w1_ref, b1_ref, w2_ref, b2_ref, o_ref):
    # x_ref:  (tile_rows, P*dim) f32   packed input points
    # w1_ref: (P*dim, P*F)       bf16  block-diagonal folded (conv1 * BN) weight
    # b1_ref: (1, P*F)           f32   folded bias (tiled P times)
    # w2_ref: (P*F, P*F)         bf16  block-diagonal conv2 weight
    # b2_ref: (1, P*F)           f32   conv2 bias (tiled P times)
    # o_ref:  (tile_rows, P*F)   out   packed output (lane-dense when P*F % 128 == 0)
    x = x_ref[...].astype(jnp.bfloat16)
    # Layer 1: bf16 MXU dot with f32 accumulation; K = P*dim stays small (Mosaic masks it).
    h = jnp.dot(x, w1_ref[...], preferred_element_type=jnp.float32) + b1_ref[...]
    h = jnp.maximum(h, 0.0)                                                  # ReLU (f32, VPU)
    # Layer 2: bf16 MXU dot with f32 accumulation.
    out = jnp.dot(h.astype(jnp.bfloat16), w2_ref[...],
                  preferred_element_type=jnp.float32) + b2_ref[...]
    o_ref[...] = out.astype(o_ref.dtype)


def _block_diag(w, p):
    """Replicate (K, F) weight into a (p*K, p*F) block-diagonal matrix."""
    if p == 1:
        return w
    K, F = w.shape
    eye = jnp.eye(p, dtype=w.dtype)
    t = eye[:, :, None, None] * w[None, None, :, :]        # (p, p, K, F)
    return t.transpose(0, 2, 1, 3).reshape(p * K, p * F)   # (p*K, p*F)


def _round_up(a, b):
    return (a + b - 1) // b * b


@functools.partial(jax.jit, static_argnames=("tm", "out_dtype"))
def learned_pos_embeddings(xyz, params, tm=32768, out_dtype=jnp.float32):
    """xyz: (B, N, dim) f32 -> (B, N, num_pos_feats) out_dtype. `tm` = max points per tile."""
    B, N, dim = xyz.shape
    w1t, b1, bn_scale, bn_shift, w2t, b2 = params
    F = w1t.shape[1]

    # Fold eval-mode BatchNorm1d (and the first conv bias) into the first layer.
    w1f = w1t * bn_scale[None, :]            # (dim, F)
    b1f = b1 * bn_scale + bn_shift           # (F,)

    # Pack P consecutive points per row so output stores are 128-lane dense.
    P = 128 // F if (F <= 128 and 128 % F == 0) else 1

    M = B * N
    granule = 8 * P                          # 8 sublanes x P points per packed row
    M_pad = _round_up(M, granule)
    x2d = xyz.reshape(M, dim)
    if M_pad != M:
        x2d = jnp.pad(x2d, ((0, M_pad - M), (0, 0)))
    rows = M_pad // P
    x_packed = x2d.reshape(rows, P * dim)    # contiguous -> free reshape

    # MXU operands in bf16 (f32 accumulation in the kernel); biases stay f32.
    W1 = _block_diag(w1f, P).astype(jnp.bfloat16)                     # (P*dim, P*F)
    B1 = jnp.tile(b1f, P).reshape(1, P * F).astype(jnp.float32)
    W2 = _block_diag(w2t.astype(jnp.float32), P).astype(jnp.bfloat16)  # (P*F, P*F)
    B2 = jnp.tile(b2, P).reshape(1, P * F).astype(jnp.float32)

    # --- Row-tile sizing against a VMEM budget -------------------------------------------------
    # Input blocks lane-pad P*dim -> 128 in VMEM, so they cost as much as a 128-wide output block.
    # Count: double-buffered input + output blocks, plus single-buffered in-kernel temporaries
    # (x bf16, h f32, h bf16, pre-cast out f32).  Budget 28 MiB under the 32 MiB scoped limit,
    # which is safe on v5e/v6e/v7x (v7x has only 64 MiB physical VMEM per TC — don't raise it).
    lane = 128
    in_pad = _round_up(P * dim, lane)
    out_pad = _round_up(P * F, lane)
    out_itemsize = jnp.dtype(out_dtype).itemsize
    bytes_per_row = (2 * in_pad * 4 + 2 * out_pad * out_itemsize          # pipelined blocks
                     + in_pad * 2 + out_pad * (4 + 2 + 4))                # kernel temporaries
    vmem_budget = 28 * 1024 * 1024
    rows_by_vmem = vmem_budget // bytes_per_row
    tile_rows = max(8, min(tm // P, rows_by_vmem) // 8 * 8)
    tile_rows = min(tile_rows, rows)
    if rows > 8:
        # Guarantee >= 2 grid blocks so v7x's second TensorCore gets work on the "parallel" axis.
        tile_rows = min(tile_rows, max(8, (rows // 2) // 8 * 8))
    n_blocks = pl.cdiv(rows, tile_rows)      # ragged last block handled by Pallas

    out_packed = pl.pallas_call(
        _pos_emb_kernel,
        out_shape=jax.ShapeDtypeStruct((rows, P * F), out_dtype),
        grid_spec=pltpu.PrefetchScalarGridSpec(
            num_scalar_prefetch=0,
            grid=(n_blocks,),
            in_specs=[
                pl.BlockSpec((tile_rows, P * dim), lambda i: (i, 0)),   # packed points (f32)
                pl.BlockSpec((P * dim, P * F), lambda i: (0, 0)),       # W1 (folded BN, bf16)
                pl.BlockSpec((1, P * F), lambda i: (0, 0)),             # b1 (folded BN, f32)
                pl.BlockSpec((P * F, P * F), lambda i: (0, 0)),         # W2 (bf16)
                pl.BlockSpec((1, P * F), lambda i: (0, 0)),             # b2 (f32)
            ],
            out_specs=pl.BlockSpec((tile_rows, P * F), lambda i: (i, 0)),
        ),
        compiler_params=pltpu.CompilerParams(
            dimension_semantics=("parallel",),        # megacore-shards the row axis on v7x
            vmem_limit_bytes=32 * 1024 * 1024,
        ),
    )(x_packed, W1, B1, W2, B2)

    out2d = out_packed.reshape(M_pad, F)
    if M_pad != M:
        out2d = out2d[:M]
    return out2d.reshape(B, N, F)


def init_params(key, dim=3, num_pos_feats=32):
    """Deterministic synthetic parameters matching the PyTorch module's shapes."""
    ks = jax.random.split(key, 8)
    F = num_pos_feats
    # Conv1d(dim, F, k=1): weight (F, dim, 1) -> stored transposed as (dim, F)
    w1 = jax.random.normal(ks[0], (F, dim), jnp.float32) * 0.1
    b1 = jax.random.normal(ks[1], (F,), jnp.float32) * 0.1
    # BatchNorm1d(F) eval-mode parameters / running stats
    gamma = 1.0 + 0.1 * jax.random.normal(ks[2], (F,), jnp.float32)
    beta = 0.1 * jax.random.normal(ks[3], (F,), jnp.float32)
    running_mean = 0.1 * jax.random.normal(ks[4], (F,), jnp.float32)
    running_var = jnp.abs(1.0 + 0.1 * jax.random.normal(ks[5], (F,), jnp.float32))
    eps = 1e-5
    bn_scale = gamma / jnp.sqrt(running_var + eps)
    bn_shift = beta - running_mean * bn_scale
    # Conv1d(F, F, k=1): weight (F, F, 1) -> stored transposed as (F, F)
    w2 = jax.random.normal(ks[6], (F, F), jnp.float32) * 0.1
    b2 = jax.random.normal(ks[7], (F,), jnp.float32) * 0.1
    return (w1.T, b1, bn_scale, bn_shift, w2.T, b2)


def reference(xyz, params):
    """Plain-JAX f32 reference of the PyTorch forward (eval-mode BN)."""
    w1t, b1, bn_scale, bn_shift, w2t, b2 = params
    h = xyz @ w1t + b1                       # Conv1d(k=1) over channel axis
    h = h * bn_scale + bn_shift              # BatchNorm1d (eval)
    h = jnp.maximum(h, 0.0)                  # ReLU
    return h @ w2t + b2                      # Conv1d(k=1)


def reference_kernel_precision(xyz, params):
    """Reference that mimics the kernel's bf16-operand / f32-accumulation numerics."""
    w1t, b1, bn_scale, bn_shift, w2t, b2 = params
    w1f = (w1t * bn_scale[None, :]).astype(jnp.bfloat16).astype(jnp.float32)
    b1f = b1 * bn_scale + bn_shift
    w2 = w2t.astype(jnp.bfloat16).astype(jnp.float32)
    x = xyz.astype(jnp.bfloat16).astype(jnp.float32)
    h = x @ w1f + b1f
    h = jnp.maximum(h, 0.0)
    h = h.astype(jnp.bfloat16).astype(jnp.float32)
    return h @ w2 + b2


if __name__ == "__main__":
    key = jax.random.PRNGKey(0)
    k_x, k_p = jax.random.split(key)

    dim, F = 3, 32
    params = init_params(k_p, dim=dim, num_pos_feats=F)

    def check(out, xyz, prm, tag, atol_mimic=1e-3):
        ref_m = reference_kernel_precision(xyz, prm)
        ref_f = reference(xyz, prm)
        assert jnp.allclose(out.astype(jnp.float32), ref_m, atol=atol_mimic, rtol=1e-3), \
            f"mismatch vs kernel-precision reference ({tag})"
        assert jnp.allclose(out.astype(jnp.float32), ref_f, atol=5e-2, rtol=5e-2), \
            f"mismatch vs f32 reference ({tag})"

    # (1) small shape, default (large, clamped) tile
    B1_, N1_ = 2, 16
    xyz1 = jax.random.normal(k_x, (B1_, N1_, dim), jnp.float32)
    out1 = jax.block_until_ready(learned_pos_embeddings(xyz1, params))
    assert out1.shape == (B1_, N1_, F)
    check(out1, xyz1, params, "case 1")

    # (2) B*N not a multiple of the packing granule -> exercises padding + slicing
    B2_, N2_ = 2, 15
    xyz2 = jax.random.normal(jax.random.fold_in(k_x, 1), (B2_, N2_, dim), jnp.float32)
    out2 = jax.block_until_ready(learned_pos_embeddings(xyz2, params))
    assert out2.shape == (B2_, N2_, F)
    check(out2, xyz2, params, "case 2")

    # (3) small explicit tile -> multi-step grid
    B3_, N3_ = 2, 64
    xyz3 = jax.random.normal(jax.random.fold_in(k_x, 2), (B3_, N3_, dim), jnp.float32)
    out3 = jax.block_until_ready(learned_pos_embeddings(xyz3, params, tm=32))
    check(out3, xyz3, params, "case 3")

    # (4) larger input -> >= 2-block split (v7x megacore path) with a ragged last block
    B4_, N4_ = 2, 1000
    xyz4 = jax.random.normal(jax.random.fold_in(k_x, 3), (B4_, N4_, dim), jnp.float32)
    out4 = jax.block_until_ready(learned_pos_embeddings(xyz4, params))
    check(out4, xyz4, params, "case 4")

    # (5) module-default num_pos_feats=288 -> P=1 (unpacked) path
    params288 = init_params(jax.random.fold_in(k_p, 1), dim=dim, num_pos_feats=288)
    xyz5 = jax.random.normal(jax.random.fold_in(k_x, 4), (2, 16, dim), jnp.float32)
    out5 = jax.block_until_ready(learned_pos_embeddings(xyz5, params288))
    assert out5.shape == (2, 16, 288)
    check(out5, xyz5, params288, "case 5")

    # (6) bf16 output flag (halves store traffic; useful on v5e)
    out6 = jax.block_until_ready(
        learned_pos_embeddings(xyz1, params, out_dtype=jnp.bfloat16))
    assert out6.dtype == jnp.bfloat16
    assert jnp.allclose(out6.astype(jnp.float32), reference_kernel_precision(xyz1, params),
                        atol=2e-2, rtol=2e-2), "mismatch vs reference (case 6, bf16 out)"

    print("KERNEL_OK")
</pallas_src>

<mosaic_0001>
module attributes {stable_mosaic.version = 11 : i64} {
  func.func @_pos_emb_kernel(%arg0: i32, %arg1: memref<8x12xf32, #tpu.memory_space<vmem>>, %arg2: memref<12x128xbf16, #tpu.memory_space<vmem>>, %arg3: memref<1x128xf32, #tpu.memory_space<vmem>>, %arg4: memref<128x128xbf16, #tpu.memory_space<vmem>>, %arg5: memref<1x128xf32, #tpu.memory_space<vmem>>, %arg6: memref<8x128xf32, #tpu.memory_space<vmem>>) attributes {dimension_semantics = [#tpu.dimension_semantics<parallel>], iteration_bounds = array<i64: 1>, scalar_prefetch = 0 : i64, scratch_operands = 0 : i64, tpu.core_type = #tpu.core_type<tc>, window_params = [{transform_indices = @transform_0, window_bounds = array<i64: 8, 12>}, {pipeline_mode = #tpu.pipeline_mode<synchronous>, transform_indices = @transform_1, window_bounds = array<i64: 12, 128>}, {pipeline_mode = #tpu.pipeline_mode<synchronous>, transform_indices = @transform_2, window_bounds = array<i64: 1, 128>}, {pipeline_mode = #tpu.pipeline_mode<synchronous>, transform_indices = @transform_3, window_bounds = array<i64: 128, 128>}, {pipeline_mode = #tpu.pipeline_mode<synchronous>, transform_indices = @transform_4, window_bounds = array<i64: 1, 128>}, {transform_indices = @transform_5, window_bounds = array<i64: 8, 128>}]} {
    %c0 = arith.constant 0 : index
    %c0_0 = arith.constant 0 : index
    %0 = vector.load %arg1[%c0, %c0_0] : memref<8x12xf32, #tpu.memory_space<vmem>>, vector<8x12xf32>
    %1 = arith.truncf %0 : vector<8x12xf32> to vector<8x12xbf16>
    %c0_1 = arith.constant 0 : index
    %c0_2 = arith.constant 0 : index
    %2 = vector.load %arg2[%c0_1, %c0_2] : memref<12x128xbf16, #tpu.memory_space<vmem>>, vector<12x128xbf16>
    %cst = arith.constant dense<0.000000e+00> : vector<8x128xf32>
    %3 = tpu.matmul %1, %2, %cst {dimension_numbers = #tpu.dot_dimension_numbers<[1], [0], [0], [1], [0, 0, 1, 1], [], []>} : vector<8x12xbf16>, vector<12x128xbf16>, vector<8x128xf32> -> vector<8x128xf32>
    %c0_3 = arith.constant 0 : index
    %c0_4 = arith.constant 0 : index
    %4 = vector.load %arg3[%c0_3, %c0_4] : memref<1x128xf32, #tpu.memory_space<vmem>>, vector<1x128xf32>
    %5 = vector.broadcast %4 : vector<1x128xf32> to vector<8x128xf32>
    %6 = arith.addf %3, %5 : vector<8x128xf32>
    %cst_5 = arith.constant 0.000000e+00 : f32
    %7 = vector.broadcast %cst_5 : f32 to vector<8x128xf32>
    %8 = arith.maximumf %6, %7 : vector<8x128xf32>
    %9 = arith.truncf %8 : vector<8x128xf32> to vector<8x128xbf16>
    %c0_6 = arith.constant 0 : index
    %c0_7 = arith.constant 0 : index
    %10 = vector.load %arg4[%c0_6, %c0_7] : memref<128x128xbf16, #tpu.memory_space<vmem>>, vector<128x128xbf16>
    %cst_8 = arith.constant dense<0.000000e+00> : vector<8x128xf32>
    %11 = tpu.matmul %9, %10, %cst_8 {dimension_numbers = #tpu.dot_dimension_numbers<[1], [0], [0], [1], [0, 0, 1, 1], [], []>} : vector<8x128xbf16>, vector<128x128xbf16>, vector<8x128xf32> -> vector<8x128xf32>
    %c0_9 = arith.constant 0 : index
    %c0_10 = arith.constant 0 : index
    %12 = vector.load %arg5[%c0_9, %c0_10] : memref<1x128xf32, #tpu.memory_space<vmem>>, vector<1x128xf32>
    %13 = vector.broadcast %12 : vector<1x128xf32> to vector<8x128xf32>
    %14 = arith.addf %11, %13 : vector<8x128xf32>
    %c0_11 = arith.constant 0 : index
    %c0_12 = arith.constant 0 : index
    %15 = vector.load %arg6[%c0_11, %c0_12] : memref<8x128xf32, #tpu.memory_space<vmem>>, vector<8x128xf32>
    tpu.vector_store %arg6[%c0_11, %c0_12], %14 {strides = array<i32>} : memref<8x128xf32, #tpu.memory_space<vmem>>, vector<8x128xf32>,
    return
  }
  func.func @transform_0(%arg0: i32) -> (i32, i32) {
    %c0_i32 = arith.constant 0 : i32
    %c0_i32_0 = arith.constant 0 : i32
    return %arg0, %c0_i32 : i32, i32
  }
  func.func @transform_1(%arg0: i32) -> (i32, i32) {
    %c0_i32 = arith.constant 0 : i32
    %c0_i32_0 = arith.constant 0 : i32
    %c0_i32_1 = arith.constant 0 : i32
    return %c0_i32, %c0_i32_0 : i32, i32
  }
  func.func @transform_2(%arg0: i32) -> (i32, i32) {
    %c0_i32 = arith.constant 0 : i32
    %c0_i32_0 = arith.constant 0 : i32
    %c0_i32_1 = arith.constant 0 : i32
    return %c0_i32, %c0_i32_0 : i32, i32
  }
  func.func @transform_3(%arg0: i32) -> (i32, i32) {
    %c0_i32 = arith.constant 0 : i32
    %c0_i32_0 = arith.constant 0 : i32
    %c0_i32_1 = arith.constant 0 : i32
    return %c0_i32, %c0_i32_0 : i32, i32
  }
  func.func @transform_4(%arg0: i32) -> (i32, i32) {
    %c0_i32 = arith.constant 0 : i32
    %c0_i32_0 = arith.constant 0 : i32
    %c0_i32_1 = arith.constant 0 : i32
    return %c0_i32, %c0_i32_0 : i32, i32
  }
  func.func @transform_5(%arg0: i32) -> (i32, i32) {
    %c0_i32 = arith.constant 0 : i32
    %c0_i32_0 = arith.constant 0 : i32
    return %arg0, %c0_i32 : i32, i32
  }
}

</mosaic_0001>

<bundles_post_ra>
// kernel: tile.13
= control target key start
LH: loop header
LB: loop body
LE: loop exit
PB: predicated region body
PF: predicated region fallthrough
CT: control target
= control target key end

     0   :  { %s22_s0 = inlined_call_operand.vmem [shape: f32[32], index: 0, kind: input, shape index: {}]   ;;  %s23_s1 = inlined_call_operand.vmem [shape: f32[4,32], index: 1, kind: output, shape index: {}]  }
   0x1   :  { %v4_v0 = vld [vmem:[%s22_s0] ss:$0 sm:$0xff] }
   0x2   :  { %5 = vst [vmem:[%s23_s1] sm:$0xf] %v4_v0 }

// kernel: tile.14
= control target key start
LH: loop header
LB: loop body
LE: loop exit
PB: predicated region body
PF: predicated region fallthrough
CT: control target
= control target key end

     0   :  { %vm8_vm0 = vcmask 261120   ;;  %s40_s8 = smov 32   ;;  %s41_s9 = smov 64   ;;  %vm14_vm1 = vcmask 1048320   ;;  %vm20_vm2 = vcmask 785920   ;;  %vm26_vm3 = vcmask 523520   ;;  %s58_s0 = inlined_call_operand.vmem [shape: f32[4,32], index: 0, kind: input, shape index: {}]   ;;  %s59_s1 = inlined_call_operand.vmem [shape: f32[1,128], index: 1, kind: output, shape index: {}]  }
   0x1   :  { %v5_v0 = vld [vmem:[%s58_s0] sm:$0xf]  ;;  %s39_s0 = smov 96  }
   0x2   :  { %6 = vst [vmem:[#allocation1] sm:$0xf] %v5_v0 }
   0x9   :  { %v11_v1 = vld [vmem:[#allocation1 + $0x3] sm:$0x1]   ;;  %v23_v2 = vld [vmem:[#allocation1 + $0x1] sm:$0x1]   ;;  %v7_v3 = vld [vmem:[#allocation1] sm:$0x1]  }
   0xa   :  { %12 = vrot.lane.b32.xlu0 %v11_v1, %s39_s0  ;;  %24 = vrot.lane.b32.xlu1 %v23_v2, %s40_s8  ;;  %v17_v4 = vld [vmem:[#allocation1 + $0x2] sm:$0x1]   ;;  %9 = vst.msk [vmem:[#allocation0] sm:$0x1] %vm8_vm0, %v7_v3  }
   0xe   :  { %18 = vrot.lane.b32.xlu0 %v17_v4, %s41_s9 }
  0x7c   :  { %v13_v5 = vpop.permute.xlu0 %12   ;;  %v25_v6 = vpop.permute.xlu1 %24  }
  0x7d   :  { %15 = vst.msk [vmem:[#allocation0] sm:$0x1] %vm14_vm1, %v13_v5  }
  0x80   :  { %v19_v7 = vpop.permute.xlu0 %18  }
  0x81   :  { %21 = vst.msk [vmem:[#allocation0] sm:$0x1] %vm20_vm2, %v19_v7  }
  0x82   :  { %27 = vst.msk [vmem:[#allocation0] sm:$0x1] %vm26_vm3, %v25_v6  }
  0x89   :  { %v32_v8 = vld [vmem:[#allocation0] sm:$0x1] }
  0x8a   :  { %35 = vst [vmem:[%s59_s1] sm:$0x1] %v32_v8 }

// kernel: learned_pos_embeddings.1
= control target key start
LH: loop header
LB: loop body
LE: loop exit
PB: predicated region body
PF: predicated region fallthrough
CT: control target
= control target key end

     0   :  { %vm41_vm0 = vcmask 1045504   ;;  %v263_v0 = vmov 0.0   ;;  %vm264_vm1 = vmmov 0   ;;  %vm37_vm2 = vcmask 97280   ;;  %s334_s1 = inlined_call_operand.vmem [shape: bf16[12,128], index: 1, kind: input, shape index: {}]   ;;  %s335_s0 = inlined_call_operand.vmem [shape: f32[8,12], index: 0, kind: input, shape index: {}]   ;;  %s336_s3 = inlined_call_operand.vmem [shape: bf16[128,128], index: 3, kind: input, shape index: {}]   ;;  %s337_s2 = inlined_call_operand.vmem [shape: f32[1,128], index: 2, kind: input, shape index: {}]   ;;  %s338_s4 = inlined_call_operand.vmem [shape: f32[1,128], index: 4, kind: input, shape index: {}]   ;;  %s339_s5 = inlined_call_operand.vmem [shape: f32[8,128], index: 5, kind: output, shape index: {}]  }
   0x1   :  { %226 = vmatprep.subr.bf16.mxu0 %v263_v0  ;;  %v254_v1 = vld [vmem:[%s334_s1] sm:$0x3f]   ;;  %228 = vmatprep.mubr.msk.bf16.mxu0 %vm264_vm1, %v263_v0  ;;  %v255_v5 = vld [vmem:[%s336_s3 + $0x38] sm:$0xff]   ;;  %v256_v6 = vld [vmem:[%s336_s3 + $0x30] sm:$0xff]  }
   0x2   :  { %v21_v2 = vld [vmem:[%s335_s0] sm:$0xff]  ;;  %232 = vmatprep.subr.bf16.mxu1 %v263_v0  ;;  %248 = vmatprep.mubr.msk.bf16.mxu1 %vm264_vm1, %v263_v0  ;;  %v43_v3 = vsel %vm41_vm0, %v254_v1, 0  ;;  %v257_v7 = vld [vmem:[%s336_s3 + $0x28] sm:$0xff]   ;;  %v259_v9 = vld [vmem:[%s336_s3 + $0x18] sm:$0xff]  }
   0x3   :  { %v22_v4 = vpack.c.bf16 %v21_v2, %v21_v2  ;;  %227 = vmatpush3.bf16.msra.mxu0 %v43_v3  ;;  %233 = vmatpush3.bf16.msra.mxu1 %v255_v5  ;;  %v258_v8 = vld [vmem:[%s336_s3 + $0x20] sm:$0xff]   ;;  %v260_v10 = vld [vmem:[%s336_s3 + $0x10] sm:$0xff]   ;;  %v261_v11 = vld [vmem:[%s336_s3 + $0x8] sm:$0xff]  }
   0x4   :  { %234 = vmatprep.subr.bf16.mxu1 %v263_v0  ;;  %v262_v12 = vld [vmem:[%s336_s3] sm:$0xff]  }
   0x5   :  { %v203_v13 = vld [vmem:[%s337_s2] ss:$0 sm:$0xff] }
   0x6   :  { %229 = vmatmul.mubr.msk.bf16.vlgmr.msra.gmra.mxu0 %vm37_vm2, %v22_v4  ;;  %v206_v21 = vld [vmem:[%s338_s4] ss:$0 sm:$0xff] }
   0x7   :  { %235 = vmatpush3.bf16.msra.mxu1 %v256_v6 }
   0x8   :  { %236 = vmatprep.subr.bf16.mxu1 %v263_v0 }
   0xb   :  { %237 = vmatpush3.bf16.msra.mxu1 %v257_v7 }
   0xc   :  { %238 = vmatprep.subr.bf16.mxu1 %v263_v0 }
   0xf   :  { %239 = vmatpush3.bf16.msra.mxu1 %v258_v8 }
  0x10   :  { %240 = vmatprep.subr.bf16.mxu1 %v263_v0 }
  0x13   :  { %241 = vmatpush3.bf16.msra.mxu1 %v259_v9 }
  0x14   :  { %242 = vmatprep.subr.bf16.mxu1 %v263_v0 }
  0x17   :  { %243 = vmatpush3.bf16.msra.mxu1 %v260_v10 }
  0x18   :  { %244 = vmatprep.subr.bf16.mxu1 %v263_v0 }
  0x1b   :  { %245 = vmatpush3.bf16.msra.mxu1 %v261_v11 }
  0x1c   :  { %246 = vmatprep.subr.bf16.mxu1 %v263_v0 }
  0x1f   :  { %247 = vmatpush3.bf16.msra.mxu1 %v262_v12 }
  0xc6   :  { %v79_v14 = vpop.f32.mrf.mxu0 }
  0xc7   :  { %v80_v15 = vadd.f32 %v203_v13, %v79_v14 }
  0xc8   :  { %v230_v16 = vpop.f32.mrf.mxu0 }
  0xc9   :  { %v85_v17 = vmax.f32 %v80_v15, 0.0 }
  0xca   :  { %v82_v18 = vpop.f32.mrf.mxu0 }
  0xcb   :  { %v86_v19 = vpack.c.bf16 %v85_v17, %v85_v17 }
  0xcc   :  { %v231_v20 = vpop.f32.mrf.mxu0 }
  0xcd   :  { %249 = vmatmul.mubr.bf16.vlgmr.msra.gmra.mxu1 %v86_v19 }
 0x18d   :  { %v192_v22 = vpop.f32.mrf.mxu1 }
 0x18e   :  { %v193_v23 = vadd.f32 %v206_v21, %v192_v22 }
 0x18f   :  { %v250_v24 = vpop.f32.mrf.mxu1 }
 0x190   :  { %198 = vst [vmem:[%s339_s5] sm:$0xff] %v193_v23 }
 0x191   :  { %v195_v25 = vpop.f32.mrf.mxu1 }
 0x193   :  { %v251_v26 = vpop.f32.mrf.mxu1 }

</bundles_post_ra>
